<compile_context>
chip_gen: v7x
topology: tpu7x:2x2x1
jax: 0.10.0
libtpu: 0.0.40
codegen_flags: <defaults>
</compile_context>

<pallas_src>
import functools

import numpy as np
import jax
import jax.numpy as jnp
from jax import lax
from jax.experimental import pallas as pl
from jax.experimental.pallas import tpu as pltpu

# Same element-wise transforms as the PyTorch FNS dict.
_FNS = {
    "sqrt": jnp.sqrt,
    "log": jnp.log,
    "log1": lambda x: jnp.log(x + 1.0),
    "linear": lambda x: x,
    "square": jnp.square,
    "disp": lambda x: 1.0 / x,
}


# ----------------------------------------------------------------------------
# Pallas kernel: streamed masked moments (S0, S1, S2) per (batch, split)
# ----------------------------------------------------------------------------
def _silog_moments_kernel(*refs, num_ch, tile_rows, kp, n_rows, eps, input_fn,
                          has_mask, need_tail):
    if has_mask:
        in_ref, tgt_ref, mask_ref, out_ref = refs
    else:
        in_ref, tgt_ref, out_ref = refs
    kk = pl.program_id(2)

    # Output block is resident across the reduction axis -> acts as accumulator.
    @pl.when(kk == 0)
    def _init():
        out_ref[...] = jnp.zeros_like(out_ref)

    fin = _FNS[input_fn]
    f32 = jnp.float32
    C = num_ch

    def ch(ref, c):
        return ref[0, c].astype(f32)                       # (TILE_H, W)

    if C == 1:
        err = (fin(jnp.maximum(ch(in_ref, 0), eps))
               - fin(jnp.maximum(ch(tgt_ref, 0), eps)))
        sq = None
    else:
        # error = || [in[:-1]-tg[:-1], log(in[-1])-log(tg[-1])] ||_2 over channels
        sq = None
        for c in range(C - 1):
            d = ch(in_ref, c) - ch(tgt_ref, c)
            sq = d * d if sq is None else sq + d * d
        dl = (fin(jnp.maximum(ch(in_ref, C - 1), eps))
              - fin(jnp.maximum(ch(tgt_ref, C - 1), eps)))
        sq = dl * dl if sq is None else sq + dl * dl
        err = jnp.sqrt(sq)

    shape = err.shape                                       # (TILE_H, W)
    TH, W = shape

    mvalid = None
    if has_mask:
        mvalid = mask_ref[0, 0] != 0                        # int8 stream -> bool
    if need_tail:
        # Ragged / over-shooting row blocks: mask rows beyond the real image.
        p = pl.program_id(1)
        start_row = (p * kp + kk) * tile_rows
        row_i = lax.broadcasted_iota(jnp.int32, shape, 0)
        valid = (row_i + start_row) < n_rows
        mvalid = valid if mvalid is None else jnp.logical_and(mvalid, valid)

    if mvalid is not None:
        # where-select (not multiply) so garbage/NaN in padded reads never leaks.
        err_c = jnp.where(mvalid, err, 0.0)
        sq_c = err_c * err_c if sq is None else jnp.where(mvalid, sq, 0.0)
    else:
        err_c = err
        sq_c = err * err if sq is None else sq

    # Fold (TILE_H, W) -> (8, W) partial sums: pure vreg adds in the hot loop,
    # the 8->1 / lane collapse happens once, outside the kernel.
    if TH % 8 == 0:
        nrow = 8

        def fold(a):
            return a.reshape(TH // 8, 8, W).sum(axis=0)
    else:  # only when the single block equals the (small) full image height
        nrow = 1

        def fold(a):
            return jnp.sum(a, axis=0, keepdims=True)

    out_ref[0, 0, 8:8 + nrow, :] += fold(err_c)             # S1
    out_ref[0, 0, 16:16 + nrow, :] += fold(sq_c)            # S2
    if has_mask:                                            # S0 only when masked
        out_ref[0, 0, 0:nrow, :] += fold(mvalid.astype(f32))


def silog_moments_pallas(inp, target, mask_i8=None, *, eps, input_fn,
                         max_tile_rows=None, vmem_budget_bytes=10 << 20):
    """inp/target: (B, C, H, W) in native dtype; mask_i8: (B, 1, H, W) int8 or None.
    Returns (S0, S1, S2), each (B,) f32.  S0 is only meaningful when mask_i8
    is given (else the caller uses the compile-time pixel count)."""
    B, C, H, W = inp.shape
    assert target.shape == (B, C, H, W)
    has_mask = mask_i8 is not None

    # ---- tile size from VMEM budget (double-buffered input bytes) ----------
    bytes_per_row = W * (C * (inp.dtype.itemsize + target.dtype.itemsize)
                         + (mask_i8.dtype.itemsize if has_mask else 0))
    th = int(vmem_budget_bytes // (2 * max(bytes_per_row, 1)))
    if max_tile_rows is not None:
        th = min(th, int(max_tile_rows))
    th = min(th, 2048)
    th = max(32, (th // 32) * 32)          # multiple of 32 covers f32/bf16/int8 tiles
    if th >= H:
        tile_rows, k_steps = H, 1          # full-extent block (any H allowed)
    else:
        tile_rows, k_steps = th, -(-H // th)

    # ---- split the reduction across both v7x TensorCores when B == 1 -------
    P = 2 if (B == 1 and k_steps >= 2) else 1
    Kp = -(-k_steps // P)
    need_tail = not (H == k_steps * tile_rows and P * Kp == k_steps)

    def row_block(b, p, kk):
        # Clamp keeps the DMA in-bounds for over-shooting split steps; the
        # kernel's iota guard (which uses the *unclamped* index) zeroes them.
        kb = jnp.minimum(p * Kp + kk, k_steps - 1)
        return (b, 0, kb, 0)

    in_specs = [pl.BlockSpec((1, C, tile_rows, W), row_block),
                pl.BlockSpec((1, C, tile_rows, W), row_block)]
    args = [inp, target]
    if has_mask:
        in_specs.append(pl.BlockSpec((1, 1, tile_rows, W), row_block))
        args.append(mask_i8)

    kernel = functools.partial(
        _silog_moments_kernel, num_ch=C, tile_rows=tile_rows, kp=Kp, n_rows=H,
        eps=float(eps), input_fn=input_fn, has_mask=has_mask,
        need_tail=need_tail)

    out = pl.pallas_call(
        kernel,
        out_shape=jax.ShapeDtypeStruct((B, P, 24, W), jnp.float32),
        grid=(B, P, Kp),
        in_specs=in_specs,
        out_specs=pl.BlockSpec((1, 1, 24, W), lambda b, p, kk: (b, p, 0, 0)),
        compiler_params=pltpu.CompilerParams(
            dimension_semantics=("parallel", "parallel", "arbitrary"),
            vmem_limit_bytes=32 * 1024 * 1024),
    )(*args)

    # rows 0:8 = S0, 8:16 = S1, 16:24 = S2 -> reduce splits/sublanes/lanes in JAX.
    sums = out.reshape(B, P, 3, 8, W).sum(axis=(1, 3, 4))   # (B, 3)
    return sums[:, 0], sums[:, 1], sums[:, 2]


# ----------------------------------------------------------------------------
# Host-side glue (forward of the SILog module, defaults abs_rel=False, legacy=False)
# ----------------------------------------------------------------------------
def _bilinear_resize_nchw(x, out_hw):
    """x: (B, C, H, W). F.interpolate(..., mode='bilinear', align_corners=False)."""
    B, C, H, W = x.shape
    Ho, Wo = out_hw
    orig_dtype = x.dtype
    x = x.astype(jnp.float32)

    def coords(in_sz, out_sz):
        src = (np.arange(out_sz, dtype=np.float64) + 0.5) * (in_sz / out_sz) - 0.5
        src = np.clip(src, 0.0, in_sz - 1)
        i0 = np.clip(np.floor(src).astype(np.int32), 0, in_sz - 1)
        i1 = np.clip(i0 + 1, 0, in_sz - 1)
        w = (src - i0).astype(np.float32)
        return i0, i1, w

    r0, r1, wr = coords(H, Ho)
    c0, c1, wc = coords(W, Wo)
    wr = jnp.asarray(wr)[None, None, :, None]
    wc = jnp.asarray(wc)[None, None, None, :]
    x_r0 = x[:, :, r0, :]
    x_r1 = x[:, :, r1, :]
    top = x_r0[:, :, :, c0] * (1.0 - wc) + x_r0[:, :, :, c1] * wc
    bot = x_r1[:, :, :, c0] * (1.0 - wc) + x_r1[:, :, :, c1] * wc
    return (top * (1.0 - wr) + bot * wr).astype(orig_dtype)


def silog_forward(inp, target, mask=None, *, interpolate=True,
                  scale_inv=None, ss_inv=None,
                  scale_pred_weight=0.15, output_fn="sqrt", input_fn="log",
                  eps=1e-5, max_tile_rows=None):
    """Faithful forward of SILog (abs_rel=False, legacy=False, norm=False defaults)."""
    B, C, H, W = target.shape
    if interpolate and inp.shape[-2:] != (H, W):
        inp = _bilinear_resize_nchw(inp, (H, W))
    inp = inp.reshape(B, C, H, W)

    mask_i8 = None
    if mask is not None:
        mask_i8 = (mask != 0).reshape(B, 1, H, W).astype(jnp.int8)

    s0, s1, s2 = silog_moments_pallas(inp, target, mask_i8, eps=eps,
                                      input_fn=input_fn,
                                      max_tile_rows=max_tile_rows)

    n = float(H * W)
    if mask is not None:
        # masked_mean_var (biased variance, clamp(mask_sum, 1) denominators)
        denom = jnp.maximum(s0, 1.0)
        mu = s1 / denom
        var = (s2 - 2.0 * mu * s1 + mu * mu * s0) / denom
    else:
        # masked_mean_var(mask=None): plain mean + torch.var (unbiased, N-1)
        mu = s1 / n
        var = (s2 - s1 * s1 / n) / max(n - 1.0, 1.0)

    scale_term = mu * mu                                   # abs_rel=False path
    if scale_inv is not None:
        scale_term = scale_term * (1.0 - scale_inv.astype(jnp.float32).reshape(-1))
    loss = var + scale_pred_weight * scale_term
    fout = _FNS[output_fn]
    out_b = fout(jnp.maximum(loss, eps))                   # per-sample, (B,)

    # TODO(synk): abs_rel=True, legacy=True and norm=True variants of the module
    # are not implemented (module defaults are abs_rel=False, legacy=False).
    if ss_inv is not None:
        keep = jnp.logical_not(ss_inv).astype(jnp.float32).reshape(-1)
        return jnp.sum(out_b * keep) / jnp.maximum(jnp.sum(keep), 1.0)
    return jnp.mean(out_b)


# ----------------------------------------------------------------------------
# Pure-JAX reference of the same math (silent correctness check)
# ----------------------------------------------------------------------------
def _silog_reference(inp, target, mask, *, gamma, eps, input_fn, output_fn):
    fin = _FNS[input_fn]
    fout = _FNS[output_fn]
    inp = inp.astype(jnp.float32)
    target = target.astype(jnp.float32)
    C = inp.shape[1]
    if C > 1:
        inp_ = jnp.concatenate([inp[:, :-1], fin(jnp.maximum(inp[:, -1:], eps))], axis=1)
        tgt_ = jnp.concatenate([target[:, :-1], fin(jnp.maximum(target[:, -1:], eps))], axis=1)
        err = jnp.sqrt(jnp.sum((inp_ - tgt_) ** 2, axis=1, keepdims=True))
    else:
        err = fin(jnp.maximum(inp, eps)) - fin(jnp.maximum(target, eps))
    if mask is None:
        mu = jnp.mean(err, axis=(-2, -1))
        var = jnp.var(err, axis=(-2, -1), ddof=1)
    else:
        m = mask.astype(jnp.float32)
        denom = jnp.maximum(jnp.sum(m, axis=(-2, -1)), 1.0)
        mu = jnp.sum(err * m, axis=(-2, -1)) / denom
        var = jnp.sum(m * (err - mu[..., None, None]) ** 2, axis=(-2, -1)) / denom
    loss = jnp.sum(var, axis=1) + gamma * jnp.sum(mu ** 2, axis=1)
    return jnp.mean(fout(jnp.maximum(loss, eps)))


if __name__ == "__main__":
    key = jax.random.PRNGKey(0)
    ks = jax.random.split(key, 8)

    # Case 1: canonical single-channel depth path (bilinear pre-resize + mask).
    B, H, W = 2, 16, 16
    pred = jax.random.uniform(ks[0], (B, 1, 8, 8), minval=0.2, maxval=5.0)
    tgt = jax.random.uniform(ks[1], (B, 1, H, W), minval=0.2, maxval=5.0)
    mask = jax.random.uniform(ks[2], (B, 1, H, W)) > 0.3

    loss1 = jax.block_until_ready(silog_forward(pred, tgt, mask))
    pred_i = _bilinear_resize_nchw(pred, (H, W))
    ref1 = _silog_reference(pred_i, tgt, mask, gamma=0.15, eps=1e-5,
                            input_fn="log", output_fn="sqrt")
    assert np.isfinite(float(loss1))
    assert np.allclose(float(loss1), float(ref1), rtol=2e-4, atol=1e-5), (loss1, ref1)

    # Case 2: multi-channel branch (norm over channels, log on last channel).
    C = 4
    pred2 = jax.random.uniform(ks[3], (B, C, H, W), minval=0.2, maxval=5.0)
    tgt2 = jax.random.uniform(ks[4], (B, C, H, W), minval=0.2, maxval=5.0)
    loss2 = jax.block_until_ready(silog_forward(pred2, tgt2, mask, interpolate=False))
    ref2 = _silog_reference(pred2, tgt2, mask, gamma=0.15, eps=1e-5,
                            input_fn="log", output_fn="sqrt")
    assert np.allclose(float(loss2), float(ref2), rtol=2e-4, atol=1e-5), (loss2, ref2)

    # Case 3: bf16 inputs streamed natively, mask=None (unbiased variance path).
    pred3 = jax.random.uniform(ks[5], (B, 1, H, W), minval=0.2, maxval=5.0).astype(jnp.bfloat16)
    tgt3 = jax.random.uniform(ks[6], (B, 1, H, W), minval=0.2, maxval=5.0).astype(jnp.bfloat16)
    loss3 = jax.block_until_ready(silog_forward(pred3, tgt3, None, interpolate=False))
    ref3 = _silog_reference(pred3, tgt3, None, gamma=0.15, eps=1e-5,
                            input_fn="log", output_fn="sqrt")
    assert np.allclose(float(loss3), float(ref3), rtol=5e-3, atol=1e-4), (loss3, ref3)

    # Case 4: B=1 with forced small row tiles: exercises the two-TensorCore
    # split, ragged last row block and in-kernel tail masking (with mask).
    H4, W4 = 44, 48
    pred4 = jax.random.uniform(ks[7], (1, 1, H4, W4), minval=0.2, maxval=5.0)
    tgt4 = jax.random.uniform(ks[0], (1, 1, H4, W4), minval=0.2, maxval=5.0)
    mask4 = jax.random.uniform(ks[1], (1, 1, H4, W4)) > 0.5
    loss4 = jax.block_until_ready(
        silog_forward(pred4, tgt4, mask4, interpolate=False, max_tile_rows=32))
    ref4 = _silog_reference(pred4, tgt4, mask4, gamma=0.15, eps=1e-5,
                            input_fn="log", output_fn="sqrt")
    assert np.allclose(float(loss4), float(ref4), rtol=2e-4, atol=1e-5), (loss4, ref4)

    # Case 5: B=1, mask=None, split over-shoots the row-block range (clamped
    # index_map + iota guard) and the last block is ragged.
    H5, W5 = 72, 16
    pred5 = jax.random.uniform(ks[2], (1, 1, H5, W5), minval=0.2, maxval=5.0)
    tgt5 = jax.random.uniform(ks[3], (1, 1, H5, W5), minval=0.2, maxval=5.0)
    loss5 = jax.block_until_ready(
        silog_forward(pred5, tgt5, None, interpolate=False, max_tile_rows=32))
    ref5 = _silog_reference(pred5, tgt5, None, gamma=0.15, eps=1e-5,
                            input_fn="log", output_fn="sqrt")
    assert np.allclose(float(loss5), float(ref5), rtol=2e-4, atol=1e-5), (loss5, ref5)

    print("KERNEL_OK")
</pallas_src>

<mosaic_0001>
module attributes {stable_mosaic.version = 11 : i64} {
  func.func @_silog_moments_kernel(%arg0: i32, %arg1: i32, %arg2: i32, %arg3: memref<1x1x16x16xf32, #tpu.memory_space<vmem>>, %arg4: memref<1x1x16x16xf32, #tpu.memory_space<vmem>>, %arg5: memref<1x1x16x16xi8, #tpu.memory_space<vmem>>, %arg6: memref<1x1x24x16xf32, #tpu.memory_space<vmem>>) attributes {dimension_semantics = [#tpu.dimension_semantics<parallel>, #tpu.dimension_semantics<parallel>, #tpu.dimension_semantics<arbitrary>], iteration_bounds = array<i64: 2, 1, 1>, scalar_prefetch = 0 : i64, scratch_operands = 0 : i64, tpu.core_type = #tpu.core_type<tc>, window_params = [{transform_indices = @transform_0, window_bounds = array<i64: 1, 1, 16, 16>}, {transform_indices = @transform_1, window_bounds = array<i64: 1, 1, 16, 16>}, {transform_indices = @transform_2, window_bounds = array<i64: 1, 1, 16, 16>}, {transform_indices = @transform_3, window_bounds = array<i64: 1, 1, 24, 16>}]} {
    %c0_i32 = arith.constant 0 : i32
    %0 = arith.cmpi eq, %arg2, %c0_i32 : i32
    %1 = arith.extui %0 : i1 to i32
    %c0_i32_0 = arith.constant 0 : i32
    %2 = arith.cmpi ne, %1, %c0_i32_0 : i32
    scf.if %2 {
      %cst_39 = arith.constant 0.000000e+00 : f32
      %47 = vector.broadcast %cst_39 : f32 to vector<1x1x24x16xf32>
      %c0_40 = arith.constant 0 : index
      %c0_41 = arith.constant 0 : index
      %c0_42 = arith.constant 0 : index
      %c0_43 = arith.constant 0 : index
      %48 = vector.load %arg6[%c0_40, %c0_41, %c0_42, %c0_43] : memref<1x1x24x16xf32, #tpu.memory_space<vmem>>, vector<1x1x24x16xf32>
      tpu.vector_store %arg6[%c0_40, %c0_41, %c0_42, %c0_43], %47 {strides = array<i32>} : memref<1x1x24x16xf32, #tpu.memory_space<vmem>>, vector<1x1x24x16xf32>,
    } else {
    }
    %c0 = arith.constant 0 : index
    %c0_1 = arith.constant 0 : index
    %c0_2 = arith.constant 0 : index
    %c0_3 = arith.constant 0 : index
    %3 = vector.load %arg3[%c0, %c0_1, %c0_2, %c0_3] : memref<1x1x16x16xf32, #tpu.memory_space<vmem>>, vector<1x1x16x16xf32>
    %4 = vector.shape_cast %3 : vector<1x1x16x16xf32> to vector<16x16xf32>
    %cst = arith.constant 9.99999974E-6 : f32
    %5 = vector.broadcast %cst : f32 to vector<16x16xf32>
    %6 = arith.maximumf %4, %5 : vector<16x16xf32>
    %7 = math.log %6 : vector<16x16xf32>
    %c0_4 = arith.constant 0 : index
    %c0_5 = arith.constant 0 : index
    %c0_6 = arith.constant 0 : index
    %c0_7 = arith.constant 0 : index
    %8 = vector.load %arg4[%c0_4, %c0_5, %c0_6, %c0_7] : memref<1x1x16x16xf32, #tpu.memory_space<vmem>>, vector<1x1x16x16xf32>
    %9 = vector.shape_cast %8 : vector<1x1x16x16xf32> to vector<16x16xf32>
    %cst_8 = arith.constant 9.99999974E-6 : f32
    %10 = vector.broadcast %cst_8 : f32 to vector<16x16xf32>
    %11 = arith.maximumf %9, %10 : vector<16x16xf32>
    %12 = math.log %11 : vector<16x16xf32>
    %13 = arith.subf %7, %12 : vector<16x16xf32>
    %c0_9 = arith.constant 0 : index
    %c0_10 = arith.constant 0 : index
    %c0_11 = arith.constant 0 : index
    %c0_12 = arith.constant 0 : index
    %14 = vector.load %arg5[%c0_9, %c0_10, %c0_11, %c0_12] : memref<1x1x16x16xi8, #tpu.memory_space<vmem>>, vector<1x1x16x16xi8>
    %15 = vector.shape_cast %14 : vector<1x1x16x16xi8> to vector<16x16xi8>
    %c0_i8 = arith.constant 0 : i8
    %16 = vector.broadcast %c0_i8 : i8 to vector<16x16xi8>
    %17 = arith.cmpi ne, %15, %16 : vector<16x16xi8>
    %cst_13 = arith.constant 0.000000e+00 : f32
    %18 = vector.broadcast %cst_13 : f32 to vector<16x16xf32>
    %19 = arith.select %17, %13, %18 : vector<16x16xi1>, vector<16x16xf32>
    %20 = arith.mulf %19, %19 : vector<16x16xf32>
    %c0_14 = arith.constant 0 : index
    %c0_15 = arith.constant 0 : index
    %c8 = arith.constant 8 : index
    %c0_16 = arith.constant 0 : index
    %21 = vector.load %arg6[%c0_14, %c0_15, %c8, %c0_16] : memref<1x1x24x16xf32, #tpu.memory_space<vmem>>, vector<1x1x8x16xf32>
    %22 = vector.shape_cast %21 : vector<1x1x8x16xf32> to vector<8x16xf32>
    %23 = vector.shape_cast %19 : vector<16x16xf32> to vector<2x8x16xf32>
    %cst_17 = arith.constant dense<0.000000e+00> : vector<8x16xf32>
    %24 = vector.multi_reduction <add>, %23, %cst_17 [0] : vector<2x8x16xf32> to vector<8x16xf32>
    %25 = arith.addf %22, %24 : vector<8x16xf32>
    %c0_18 = arith.constant 0 : index
    %c0_19 = arith.constant 0 : index
    %c8_20 = arith.constant 8 : index
    %c0_21 = arith.constant 0 : index
    %26 = vector.load %arg6[%c0_18, %c0_19, %c8_20, %c0_21] : memref<1x1x24x16xf32, #tpu.memory_space<vmem>>, vector<1x1x8x16xf32>
    %27 = vector.shape_cast %26 : vector<1x1x8x16xf32> to vector<8x16xf32>
    %28 = vector.shape_cast %25 : vector<8x16xf32> to vector<1x1x8x16xf32>
    tpu.vector_store %arg6[%c0_18, %c0_19, %c8_20, %c0_21], %28 {strides = array<i32>} : memref<1x1x24x16xf32, #tpu.memory_space<vmem>>, vector<1x1x8x16xf32>,
    %c0_22 = arith.constant 0 : index
    %c0_23 = arith.constant 0 : index
    %c16 = arith.constant 16 : index
    %c0_24 = arith.constant 0 : index
    %29 = vector.load %arg6[%c0_22, %c0_23, %c16, %c0_24] : memref<1x1x24x16xf32, #tpu.memory_space<vmem>>, vector<1x1x8x16xf32>
    %30 = vector.shape_cast %29 : vector<1x1x8x16xf32> to vector<8x16xf32>
    %31 = vector.shape_cast %20 : vector<16x16xf32> to vector<2x8x16xf32>
    %cst_25 = arith.constant dense<0.000000e+00> : vector<8x16xf32>
    %32 = vector.multi_reduction <add>, %31, %cst_25 [0] : vector<2x8x16xf32> to vector<8x16xf32>
    %33 = arith.addf %30, %32 : vector<8x16xf32>
    %c0_26 = arith.constant 0 : index
    %c0_27 = arith.constant 0 : index
    %c16_28 = arith.constant 16 : index
    %c0_29 = arith.constant 0 : index
    %34 = vector.load %arg6[%c0_26, %c0_27, %c16_28, %c0_29] : memref<1x1x24x16xf32, #tpu.memory_space<vmem>>, vector<1x1x8x16xf32>
    %35 = vector.shape_cast %34 : vector<1x1x8x16xf32> to vector<8x16xf32>
    %36 = vector.shape_cast %33 : vector<8x16xf32> to vector<1x1x8x16xf32>
    tpu.vector_store %arg6[%c0_26, %c0_27, %c16_28, %c0_29], %36 {strides = array<i32>} : memref<1x1x24x16xf32, #tpu.memory_space<vmem>>, vector<1x1x8x16xf32>,
    %c0_30 = arith.constant 0 : index
    %c0_31 = arith.constant 0 : index
    %c0_32 = arith.constant 0 : index
    %c0_33 = arith.constant 0 : index
    %37 = vector.load %arg6[%c0_30, %c0_31, %c0_32, %c0_33] : memref<1x1x24x16xf32, #tpu.memory_space<vmem>>, vector<1x1x8x16xf32>
    %38 = vector.shape_cast %37 : vector<1x1x8x16xf32> to vector<8x16xf32>
    %39 = arith.extui %17 : vector<16x16xi1> to vector<16x16xi32>
    %40 = arith.sitofp %39 : vector<16x16xi32> to vector<16x16xf32>
    %41 = vector.shape_cast %40 : vector<16x16xf32> to vector<2x8x16xf32>
    %cst_34 = arith.constant dense<0.000000e+00> : vector<8x16xf32>
    %42 = vector.multi_reduction <add>, %41, %cst_34 [0] : vector<2x8x16xf32> to vector<8x16xf32>
    %43 = arith.addf %38, %42 : vector<8x16xf32>
    %c0_35 = arith.constant 0 : index
    %c0_36 = arith.constant 0 : index
    %c0_37 = arith.constant 0 : index
    %c0_38 = arith.constant 0 : index
    %44 = vector.load %arg6[%c0_35, %c0_36, %c0_37, %c0_38] : memref<1x1x24x16xf32, #tpu.memory_space<vmem>>, vector<1x1x8x16xf32>
    %45 = vector.shape_cast %44 : vector<1x1x8x16xf32> to vector<8x16xf32>
    %46 = vector.shape_cast %43 : vector<8x16xf32> to vector<1x1x8x16xf32>
    tpu.vector_store %arg6[%c0_35, %c0_36, %c0_37, %c0_38], %46 {strides = array<i32>} : memref<1x1x24x16xf32, #tpu.memory_space<vmem>>, vector<1x1x8x16xf32>,
    return
  }
  func.func @transform_0(%arg0: i32, %arg1: i32, %arg2: i32) -> (i32, i32, i32, i32) {
    %c1_i32 = arith.constant 1 : i32
    %0 = arith.muli %arg1, %c1_i32 : i32
    %1 = arith.addi %0, %arg2 : i32
    %c0_i32 = arith.constant 0 : i32
    %2 = arith.minsi %1, %c0_i32 : i32
    %c0_i32_0 = arith.constant 0 : i32
    %c0_i32_1 = arith.constant 0 : i32
    %c0_i32_2 = arith.constant 0 : i32
    return %arg0, %c0_i32_0, %2, %c0_i32_1 : i32, i32, i32, i32
  }
  func.func @transform_1(%arg0: i32, %arg1: i32, %arg2: i32) -> (i32, i32, i32, i32) {
    %c1_i32 = arith.constant 1 : i32
    %0 = arith.muli %arg1, %c1_i32 : i32
    %1 = arith.addi %0, %arg2 : i32
    %c0_i32 = arith.constant 0 : i32
    %2 = arith.minsi %1, %c0_i32 : i32
    %c0_i32_0 = arith.constant 0 : i32
    %c0_i32_1 = arith.constant 0 : i32
    %c0_i32_2 = arith.constant 0 : i32
    return %arg0, %c0_i32_0, %2, %c0_i32_1 : i32, i32, i32, i32
  }
  func.func @transform_2(%arg0: i32, %arg1: i32, %arg2: i32) -> (i32, i32, i32, i32) {
    %c1_i32 = arith.constant 1 : i32
    %0 = arith.muli %arg1, %c1_i32 : i32
    %1 = arith.addi %0, %arg2 : i32
    %c0_i32 = arith.constant 0 : i32
    %2 = arith.minsi %1, %c0_i32 : i32
    %c0_i32_0 = arith.constant 0 : i32
    %c0_i32_1 = arith.constant 0 : i32
    %c0_i32_2 = arith.constant 0 : i32
    return %arg0, %c0_i32_0, %2, %c0_i32_1 : i32, i32, i32, i32
  }
  func.func @transform_3(%arg0: i32, %arg1: i32, %arg2: i32) -> (i32, i32, i32, i32) {
    %c0_i32 = arith.constant 0 : i32
    %c0_i32_0 = arith.constant 0 : i32
    %c0_i32_1 = arith.constant 0 : i32
    return %arg0, %arg1, %c0_i32, %c0_i32_0 : i32, i32, i32, i32
  }
}

</mosaic_0001>

<bundles_post_ra>
// kernel: tpu_custom_call.1
= control target key start
LH: loop header
LB: loop body
LE: loop exit
PB: predicated region body
PF: predicated region fallthrough
CT: control target
= control target key end

     0   :  { %8 = vsyncpa [#allocation3], 0  ;;  %s1100_s0 = inlined_call_operand.hbm [shape: f32[2,1,16,16], index: 0, kind: input, shape index: {}]   ;;  %s1101_s1 = inlined_call_operand.hbm [shape: f32[2,1,16,16], index: 1, kind: input, shape index: {}]   ;;  %s1102_s2 = inlined_call_operand.hbm [shape: s8[2,1,16,16], index: 2, kind: input, shape index: {}]   ;;  %s1103_s3 = inlined_call_operand.vmem [shape: f32[2,1,24,16], index: 3, kind: output, shape index: {}]  }
   0x1   :  { %10 = vsyncpa [#allocation3 + $0x1], 0 }
   0x2   :  { %11 = vsyncpa [#allocation5], 0 }
   0x3   :  { %13 = vsyncpa [#allocation5 + $0x1], 0  ;;  %s843_s12 = smov 0   ;;  %s845_s13 = smov 0  }
   0x4   :  { %s847_s14 = smov 0   ;;  %s849_s15 = smov 0  }
   0x5   :  { %s851_s16 = smov 0   ;;  %s853_s17 = smov 0  }
   0x6 LB: > { %s1105_s18 = sadd.s32 4294967295, %s812_s17   ;;  %s38_s19 = sadd.s32 1, %s808_s16  ;;  %s812_s17 = sphi %s853_s17, %s19_s17   ;;  %s808_s16 = sphi %s851_s16, %s1122_s16   ;;  %s804_s15 = sphi %s849_s15, %s1121_s15   ;;  %s800_s14 = sphi %s847_s14, %s1120_s14   ;;  %s796_s13 = sphi %s845_s13, %s1119_s13   ;;  %s792_s12 = sphi %s843_s12, %s1118_s12  }
   0x7   : > { %p40_p0 = scmp.ge.s32.totalorder %s38_s19, 2  ;;  %s53_s20 = sadd.s32 1, %s800_s14 }
   0x8   : > { %p60_p1 = scmp.ne.s32.totalorder %s800_s14, %s796_s13  ;;  %p61_p2 = scmp.eq.s32.totalorder %s812_s17, 0 }
   0x9   : > { %s1124_s19 = smov (%p40_p0, %s38_s19), 0  ;;  %p66_p4 = scmp.ne.s32.totalorder %s796_s13, %s792_s12 }
   0xa   : > { %p62_p3 = por %p61_p2, %p60_p1  ;;  %s48_s21 = ssub.s32 %s808_s16, %s1124_s19 }
   0xb   : > { %p67_p5 = scmp.eq.s32.totalorder %s1105_s18, 0  ;;  %p51_p6 = scmp.eq.s32.totalorder %s48_s21, 0 }
   0xc   : > { %p605_p8 = scmp.lt.s32.totalorder %s812_s17, 2  ;;  %s893_s24 = sand.u32 1, %s800_s14  }
   0xd   : > { %p884_p7 = por %p67_p5, %p66_p4  ;;  %s585_s25 = sshll.u32 %s808_s16, 8 }
   0xe   : > { %s890_s23 = scalar_select %p51_p6, %s800_s14, %s53_s20  }
   0xf   : > { %s1106_s22 = scalar_select %p884_p7, 1, 0 }
  0x10   : > { %s567_s26 = sshll.u32 %s893_s24, 4  ;;  %p897_p9 = pnand %p605_p8, %p62_p3 }
  0x11   : > { %s212_s28 = sand.u32 1, %s812_s17   ;;  %s907_s4 = scalar_lea.hbm %s1101_s1, %s585_s25 }
  0x12   : > { %s216_s5 = scalar_lea.vmem [#allocation4], %s567_s26  ;;  %s914_s7 = scalar_lea.sflag [#allocation5], %s212_s28 }
  0x13   : > { %s228_s6 = sshll.u32 %s216_s5, 4  ;;  %s668_s8 = scalar_lea.hbm %s907_s4, 256  ;;  %s911_s6 = int_to_ptr.vmem [resolvable:$true] %s228_s6 }
  0x14   : > { %p669_p11 = scmp.ne.s32.totalorder %s907_s4, %s668_s8  ;;  %p920_p12 = pneg %p897_p9 }
  0x15   : > { %s673_s12 = scalar_lea.hbm %s1101_s1, 512  ;;  %p674_p1 = scmp.lt.u32.totalorder %s907_s4, %s1101_s1 }
  0x16   : > { %p671_p13 = pnand %p920_p12, %p669_p11  ;;  %p675_p2 = scmp.lt.u32.totalorder %s673_s12, %s668_s8 }
  0x17   : > { %p677_p4 = scmp.lt.u32.totalorder %s668_s8, %s907_s4 }
  0x18   : > { %p672_p0 = pneg %p671_p13  ;;  %p676_p3 = por %p675_p2, %p674_p1 }
  0x1a   : > { %p678_p5 = por %p677_p4, %p676_p3 }
  0x1c   : > { %p679_p6 = pnand %p678_p5, %p672_p0 }
  0x1e   : > { %682 = shalt.err (!%p679_p6)
}
  0x1f   : > { %s683_s28 = scalar_lea.vmem %s911_s6, 256  ;;  %s814_s29 = smov [#allocation4]  }
  0x20   : > { %p684_p8 = scmp.ne.s32.totalorder %s911_s6, %s683_s28  ;;  %s688_s30 = sshll.u32 %s814_s29, 4  ;;  %s689_s30 = int_to_ptr.vmem [resolvable:$false] %s688_s30 }
  0x21   : > { %s690_s5 = scalar_lea.vmem %s689_s30, 512  ;;  %p691_p10 = scmp.lt.s32.totalorder %s911_s6, %s689_s30 }
  0x22   : > { %p686_p11 = pnand %p684_p8, %p920_p12  ;;  %p692_p7 = scmp.lt.s32.totalorder %s690_s5, %s683_s28 }
  0x24   : > { %p687_p13 = pneg %p686_p11  ;;  %p693_p1 = por %p692_p7, %p691_p10 }
  0x26   : > { %p694_p2 = pnand %p693_p1, %p687_p13 }
  0x28   : > { %697 = shalt.err (!%p694_p2)
}
  0x29   : > { %s815_s8 = smov 128   ;;  %s816_s10 = smov 8  }
  0x2a   : > { %601 = dma.hbm_to_vmem [thread:$0]  (!%p897_p9), %s907_s4, 256, %s911_s6, %s914_s7, %s815_s8, %s815_s8, %s816_s10  }
  0x2b   : > { %p262_p7 = scmp.lt.s32.totalorder %s812_s17, 3  ;;  %p1109_p10 = scmp.ge.s32.totalorder %s812_s17, 1 }
  0x2c   : > { %s959_s21 = scalar_lea.hbm %s1100_s0, %s585_s25  ;;  %s190_s28 = scalar_lea.vmem [#allocation2], %s567_s26 }
  0x2d   : > { %p950_p0 = pnand %p1109_p10, %p262_p7  ;;  %s202_s29 = sshll.u32 %s190_s28, 4  ;;  %s963_s29 = int_to_ptr.vmem [resolvable:$true] %s202_s29 }
  0x2e   : > { %s573_s4 = sshll.u32 %s893_s24, 2  ;;  %s187_s6 = scalar_lea.sflag [#allocation3], %s893_s24 }
  0x2f   : > { %s1110_s11 = scalar_select %p950_p0, 1, 0 }
  0x30   : > { %s698_s30 = scalar_lea.hbm %s959_s21, 256  ;;  %s703_s25 = scalar_lea.hbm %s1100_s0, 512 }
  0x31   : > { %p699_p3 = scmp.ne.s32.totalorder %s959_s21, %s698_s30  ;;  %p704_p6 = scmp.lt.u32.totalorder %s959_s21, %s1100_s0 }
  0x32   : > { %p705_p8 = scmp.lt.u32.totalorder %s703_s25, %s698_s30  ;;  %p707_p13 = scmp.lt.u32.totalorder %s698_s30, %s959_s21 }
  0x33   : > { %p701_p4 = pnand %p699_p3, %p920_p12 }
  0x34   : > { %p706_p11 = por %p705_p8, %p704_p6 }
  0x35   : > { %p702_p5 = pneg %p701_p4 }
  0x36   : > { %p708_p1 = por %p707_p13, %p706_p11 }
  0x38   : > { %p709_p2 = pnand %p708_p1, %p702_p5 }
  0x3a   : > { %712 = shalt.err (!%p709_p2)
}
  0x3b   : > { %s713_s26 = scalar_lea.vmem %s963_s29, 256  ;;  %s817_s28 = smov [#allocation2]  }
  0x3c   : > { %p714_p7 = scmp.ne.s32.totalorder %s963_s29, %s713_s26  ;;  %s718_s5 = sshll.u32 %s817_s28, 4  ;;  %s719_s5 = int_to_ptr.vmem [resolvable:$false] %s718_s5 }
  0x3d   : > { %s720_s18 = scalar_lea.vmem %s719_s5, 512  ;;  %p721_p4 = scmp.lt.s32.totalorder %s963_s29, %s719_s5 }
  0x3e   : > { %p716_p10 = pnand %p714_p7, %p920_p12  ;;  %p722_p0 = scmp.lt.s32.totalorder %s720_s18, %s713_s26 }
  0x40   : > { %p717_p3 = pneg %p716_p10  ;;  %p723_p6 = por %p722_p0, %p721_p4 }
  0x42   : > { %p724_p8 = pnand %p723_p6, %p717_p3 }
  0x44   : > { %727 = shalt.err (!%p724_p8)
}
  0x45   : > { %598 = dma.hbm_to_vmem [thread:$0]  (!%p897_p9), %s959_s21, 256, %s963_s29, %s187_s6, %s815_s8, %s815_s8, %s816_s10  }
  0x46   : > { %s587_s30 = sshll.u32 %s808_s16, 6  ;;  %s242_s26 = scalar_lea.vmem [#allocation6], %s573_s4 }
  0x47   : > { %s997_s20 = scalar_lea.hbm %s1102_s2, %s587_s30  ;;  %s254_s28 = sshll.u32 %s242_s26, 4  ;;  %s1001_s28 = int_to_ptr.vmem [resolvable:$true] %s254_s28 }
  0x48   : > { %s728_s5 = scalar_lea.hbm %s997_s20, 64  ;;  %s733_s21 = scalar_lea.hbm %s1102_s2, 128 }
  0x49   : > { %p729_p0 = scmp.ne.s32.totalorder %s997_s20, %s728_s5  ;;  %p734_p13 = scmp.lt.u32.totalorder %s997_s20, %s1102_s2 }
  0x4a   : > { %p735_p1 = scmp.lt.u32.totalorder %s733_s21, %s728_s5  ;;  %p737_p7 = scmp.lt.u32.totalorder %s728_s5, %s997_s20 }
  0x4b   : > { %p731_p5 = pnand %p729_p0, %p920_p12 }
  0x4c   : > { %p736_p2 = por %p735_p1, %p734_p13 }
  0x4d   : > { %p732_p11 = pneg %p731_p5 }
  0x4e   : > { %p738_p10 = por %p737_p7, %p736_p2 }
  0x50   : > { %p739_p3 = pnand %p738_p10, %p732_p11 }
  0x52   : > { %742 = shalt.err (!%p739_p3)
}
  0x53   : > { %s743_s24 = scalar_lea.vmem %s1001_s28, 64  ;;  %s818_s4 = smov [#allocation6]  }
  0x54   : > { %p744_p4 = scmp.ne.s32.totalorder %s1001_s28, %s743_s24  ;;  %s748_s18 = sshll.u32 %s818_s4, 4  ;;  %s749_s18 = int_to_ptr.vmem [resolvable:$false] %s748_s18 }
  0x55   : > { %s750_s30 = scalar_lea.vmem %s749_s18, 128  ;;  %p751_p0 = scmp.lt.s32.totalorder %s1001_s28, %s749_s18 }
  0x56   : > { %p746_p6 = pnand %p744_p4, %p920_p12  ;;  %p752_p5 = scmp.lt.s32.totalorder %s750_s30, %s743_s24 }
  0x58   : > { %p747_p8 = pneg %p746_p6  ;;  %p753_p13 = por %p752_p5, %p751_p0 }
  0x5a   : > { %p754_p1 = pnand %p753_p13, %p747_p8 }
  0x5c   : > { %757 = shalt.err (!%p754_p1)
}
  0x5d   : > { %s819_s12 = smov 32   ;;  %s820_s25 = smov 2  }
  0x5e   : > { %604 = dma.hbm_to_vmem [thread:$0]  (!%p897_p9), %s997_s20, 64, %s1001_s28, %s914_s7, %s819_s12, %s819_s12, %s820_s25  }
  0x5f   : > { %p1111_p12 = scmp.ne.s32.totalorder %s1110_s11, 0 }
  0x60   : > { %s268_s9 = sand.u32 (!%p1111_p12), 1, %s796_s13   ;;  %p1112_p11 = scmp.ne.s32.totalorder (!%p1111_p12), %s1106_s22, 0 }
  0x61   : > { %266 = sbr.rel (%p1111_p12) target bundleno = 140 (0x8c), region = 32  ;;  %s577_s26 = sshll.u32 (!%p1111_p12), %s268_s9, 4 }
  0x62   : > { %s269_s5 = scalar_lea.sflag (!%p1111_p12), [#allocation3], %s268_s9  ;;  %s272_s8 = scalar_lea.vmem (!%p1111_p12), [#allocation2], %s577_s26 }
  0x68   : > { %783 = dma.done.wait (%p1112_p11), %s269_s5, 256  }
  0x69   : > { %785 = vsyncadd (%p1112_p11), %s269_s5, 4294967040  ;;  %s1113_s10 = sadd.s32 4294967295, %s812_s17   ;;  %s281_s7 = scalar_lea.vmem [#allocation4], %s577_s26 }
  0x6a   : > { %s277_s21 = sand.u32 1, %s1113_s10  }
  0x6b   : > { %s278_s27 = scalar_lea.sflag [#allocation5], %s277_s21 }
  0x6c   : > { %787 = dma.done.wait (%p1112_p11), %s278_s27, 320  }
  0x6d   : > { %789 = vsyncadd (%p1112_p11), %s278_s27, 4294966976  ;;  %p339_p9 = scmp.lt.s32.totalorder %s804_s15, 1  ;;  %s579_s11 = sshll.u32 %s268_s9, 2  ;;  %vm354_vm0 = vcmask 130048   ;;  %v821_v0 = vmov 0.0   ;;  %v358_v3 = vld [vmem:[%s272_s8] sm:$0xff] }
  0x6e   : > { %s290_s22 = scalar_lea.vmem [#allocation6], %s579_s11  ;;  %v359_v4 = vld [vmem:[%s272_s8 + $0x8] sm:$0xff]  ;;  %v360_v5 = vmax.f32 %v358_v3, 1e-05  ;;  %v366_v6 = vld [vmem:[%s281_s7] sm:$0xff]  ;;  %v822_v8 = vmov 0  }
  0x6f   : > { %s1126_s15 = smov (!%p339_p9, %s804_s15), 1  ;;  %v376_v1 = vld [vmem:[%s290_s22] sm:$0x3]  ;;  %v377_v2 = vld [vmem:[%s290_s22 + $0x2] sm:$0x3]  ;;  %v367_v7 = vld [vmem:[%s281_s7 + $0x8] sm:$0xff] }
  0x70   : > { %s588_s20 = smul.u32 24, %s1126_s15  ;;  %vm378_vm1 = vnez %v376_v1  ;;  %vm379_vm2 = vnez %v377_v2  ;;  %v361_v11 = vmax.f32 %v359_v4, 1e-05  ;;  %660 = vlog2.f32 %v360_v5 }
  0x71   : > { %v380_v9 = vsel %vm378_vm1, 16843009, %v822_v8  ;;  %v381_v10 = vsel %vm379_vm2, 16843009, %v822_v8  ;;  %v368_v14 = vmax.f32 %v366_v6, 1e-05 }
  0x72   : > { %s1043_s6 = scalar_lea.vmem %s1103_s3, %s588_s20  ;;  %v382_v12 = vunpack.c.0.s8 %v380_v9  ;;  %v383_v13 = vunpack.c.0.s8 %v381_v10  ;;  %662 = vlog2.f32 %v361_v11  ;;  %v369_v15 = vmax.f32 %v367_v7, 1e-05 }
  0x73   : > { %355 = vst.msk [vmem:[%s1043_s6] sm:$0xff] %vm354_vm0, %v821_v0  ;;  %356 = vst.msk [vmem:[%s1043_s6 + $0x8] sm:$0xff] %vm354_vm0, %v821_v0  ;;  %664 = vlog2.f32 %v368_v14 }
  0x74   : > { %357 = vst.msk [vmem:[%s1043_s6 + $0x10] sm:$0xff] %vm354_vm0, %v821_v0  ;;  %vm1051_vm3 = vcmp.ne.s32.totalorder %v382_v12, 0  ;;  %vm1055_vm4 = vcmp.ne.s32.totalorder %v383_v13, 0  ;;  %666 = vlog2.f32 %v369_v15 }
  0x75   : > { %v581_v18 = vsel %vm1051_vm3, 1.0, %v821_v0  ;;  %v582_v19 = vsel %vm1055_vm4, 1.0, %v821_v0 }
  0x76   : > { %v408_v21 = vsel %vm354_vm0, %v581_v18, 0.0  ;;  %v409_v22 = vsel %vm354_vm0, %v582_v19, 0.0 }
  0x77   : > { %v410_v23 = vadd.f32 %v409_v22, %v408_v21 }
  0x7a   : > { %v403_v20 = vld [vmem:[%s1043_s6] sm:$0xff]  ;;  %v661_v25 = vpop.eup %660  ;;  %v390_v39 = vld [vmem:[%s1043_s6 + $0x8] sm:$0xff] }
  0x7b   : > { %v411_v24 = vadd.f32 %v410_v23, %v403_v20  ;;  %v363_v27 = vmul.f32 0.6931472, %v661_v25  ;;  %v397_v44 = vld [vmem:[%s1043_s6 + $0x10] sm:$0xff] }
  0x7c   : > { %v663_v26 = vpop.eup %662 }
  0x7d   : > { %412 = vst.msk [vmem:[%s1043_s6] sm:$0xff] %vm354_vm0, %v411_v24  ;;  %v665_v28 = vpop.eup %664  ;;  %v365_v29 = vmul.f32 0.6931472, %v663_v26 }
  0x7e   : > { %v667_v30 = vpop.eup %666  ;;  %v371_v31 = vmul.f32 0.6931472, %v665_v28 }
  0x7f   : > { %v373_v32 = vmul.f32 0.6931472, %v667_v30 }
  0x80   : > { %v374_v33 = vsub.f32 %v363_v27, %v371_v31 }
  0x81   : > { %v375_v34 = vsub.f32 %v365_v29, %v373_v32 }
  0x82   : > { %v386_v35 = vsel %vm1051_vm3, %v374_v33, 0.0 }
  0x83   : > { %v387_v36 = vsel %vm1055_vm4, %v375_v34, 0.0  ;;  %v392_v37 = vsel %vm354_vm0, %v386_v35, 0.0  ;;  %v388_v38 = vmul.f32 %v386_v35, %v386_v35 }
  0x84   : > { %v393_v40 = vsel %vm354_vm0, %v387_v36, 0.0  ;;  %v389_v41 = vmul.f32 %v387_v36, %v387_v36 }
  0x85   : > { %v394_v42 = vadd.f32 %v393_v40, %v392_v37  ;;  %v398_v43 = vsel %vm354_vm0, %v388_v38, 0.0 }
  0x86   : > { %v399_v45 = vsel %vm354_vm0, %v389_v41, 0.0 }
  0x87   : > { %v395_v46 = vadd.f32 %v394_v42, %v390_v39  ;;  %v400_v47 = vadd.f32 %v399_v45, %v398_v43 }
  0x89   : > { %396 = vst.msk [vmem:[%s1043_s6 + $0x8] sm:$0xff] %vm354_vm0, %v395_v46  ;;  %v401_v48 = vadd.f32 %v400_v47, %v397_v44 }
  0x8b   : > { %402 = vst.msk [vmem:[%s1043_s6 + $0x10] sm:$0xff] %vm354_vm0, %v401_v48 }
  0x8c PF: > { %s19_s17 = sadd.s32 1, %s812_s17   ;;  %s1118_s12 = smov %s796_s13 }
  0x8d   : > { %p16_p2 = scmp.ge.s32.totalorder %s19_s17, 4   ;;  %s1119_s13 = smov %s800_s14 }
  0x8e   : > { %s1120_s14 = smov %s890_s23  ;;  %s1121_s15 = smov %s808_s16 }
  0x8f   : > { %s1122_s16 = smov %s1124_s19  ;;  %18 = sbr.rel (!%p16_p2) target bundleno = 6 (0x6), region = 100 }
  0x96   :  { %442 = vsyncpa [#allocation3], 1 }
  0x97   :  { %444 = vsyncpa [#allocation3 + $0x1], 1 }
  0x98   :  { %445 = vsyncpa [#allocation5], 1 }
  0x99   :  { %447 = vsyncpa [#allocation5 + $0x1], 1 }

</bundles_post_ra>
